<compile_context>
chip_gen: v6e
topology: v6e:2x2x1
jax: 0.10.0
libtpu: 0.0.40
codegen_flags: <defaults>
</compile_context>

<pallas_src>
import jax
import jax.numpy as jnp
from jax.experimental import pallas as pl
from jax.experimental.pallas import tpu as pltpu


def _cat_linear_kernel(order_ref, cat_ref, x_ref, w_ref, b_ref, o_ref):
    # order_ref / cat_ref are SMEM scalar-prefetch refs; order is consumed only
    # by the index_maps, cat is used here to pick the bias row.
    del order_ref
    i = pl.program_id(1)                       # sorted-batch position
    c = cat_ref[i]                             # this step's category id
    # x_ref: (tt, D), w_ref: (D, th), b_ref: (C, th) f32, o_ref: (tt, th)
    acc = jnp.dot(x_ref[...], w_ref[...], preferred_element_type=jnp.float32)
    o_ref[...] = (acc + b_ref[pl.ds(c, 1), :]).astype(o_ref.dtype)


def _pick_tile(dim, target, align):
    """Largest `align`-multiple divisor of `dim` that is <= target, else full dim."""
    if dim <= target:
        return dim
    t = (min(target, dim) // align) * align
    while t >= align:
        if dim % t == 0:
            return t
        t -= align
    return dim


def _vmem_capacity_bytes(default=64 * 1024 * 1024):
    """Physical VMEM per core; conservative (v7x) fallback if the query fails."""
    try:
        cap = getattr(pltpu.get_tpu_info(), "vmem_capacity_bytes", None)
        if cap:
            return int(cap)
    except Exception:
        pass
    return default


def category_specific_linear(x, cat_ids, W, b, *, t_tile=256, h_tile=None,
                             compute_dtype=jnp.bfloat16, vmem_headroom=0.85):
    """x: (B, T, D); cat_ids: (B,) int; W: (C, D, H); b: (C, H) -> (B, T, H)."""
    B, T, D = x.shape
    C, Dw, H = W.shape
    assert Dw == D and b.shape == (C, H)
    out_dtype = x.dtype

    # PyTorch would raise on an out-of-range index; here we clamp so the
    # data-dependent index_maps never DMA out-of-bounds HBM.
    cat_ids = jnp.clip(cat_ids.astype(jnp.int32), 0, C - 1)

    # Cheap host-side argsort of the (B,) ids only; the activation permutation
    # itself happens inside the pipeline DMA via the index_maps below.
    order = jnp.argsort(cat_ids).astype(jnp.int32)
    cat_sorted = jnp.take(cat_ids, order, axis=0).astype(jnp.int32)

    if compute_dtype is not None:   # bf16 default: halves the dominant W DMA.
        x = x.astype(compute_dtype)
        W = W.astype(compute_dtype)
    b = b.astype(jnp.float32)       # bias added in f32 (single cast, in wrapper)

    in_itemsize = jnp.dtype(x.dtype).itemsize
    out_itemsize = jnp.dtype(out_dtype).itemsize

    vmem_cap = _vmem_capacity_bytes()
    if h_tile is None:
        # 128-MiB parts (v5e/v6e) take bigger H tiles; v7x (64 MiB) stays at 512.
        h_tile = 1024 if vmem_cap >= (96 << 20) else 512

    # dtype-aware sublane alignment: 8 rows/f32, 16/bf16, 32/int8-fp8.
    t_align = max(8, 32 // in_itemsize)
    tt = _pick_tile(T, t_tile, t_align)    # sublane-aligned T tile (or full T)
    th = _pick_tile(H, h_tile, 128)        # lane-dense H tile (or full H)

    # h outermost, sorted batch middle, t innermost:
    #  -> W block index constant across t AND across consecutive same-cat i.
    grid = (H // th, B, T // tt)

    grid_spec = pltpu.PrefetchScalarGridSpec(
        num_scalar_prefetch=2,
        grid=grid,
        in_specs=[
            # x[order[i], t*tt:(t+1)*tt, :]
            pl.BlockSpec((pl.Squeezed(), tt, D),
                         lambda h, i, t, ord_, cat: (ord_[i], t, 0)),
            # W[cat_sorted[i], :, h*th:(h+1)*th]  (DMA skipped on repeats)
            pl.BlockSpec((pl.Squeezed(), D, th),
                         lambda h, i, t, ord_, cat: (cat[i], 0, h)),
            # b[:, h*th:(h+1)*th] — whole category axis resident in VMEM,
            # refetched only when the h tile changes.
            pl.BlockSpec((C, th),
                         lambda h, i, t, ord_, cat: (0, h)),
        ],
        # out[order[i], t*tt:(t+1)*tt, h*th:(h+1)*th] — unique block per step.
        out_specs=pl.BlockSpec((pl.Squeezed(), tt, th),
                               lambda h, i, t, ord_, cat: (ord_[i], t, h)),
    )

    # Rough double-buffered VMEM footprint; leave headroom under the physical cap.
    c_pad = max(8, C)
    est_vmem = 2 * ((tt * D + D * th) * in_itemsize
                    + tt * th * out_itemsize
                    + c_pad * th * 4)
    vmem_limit = int(min(max(2 * est_vmem, 32 * 1024 * 1024),
                         int(vmem_headroom * vmem_cap)))

    # Megacore (v7x): only axes whose split keeps the W DMA-skip intact.
    dim_sem = (
        "parallel" if (H // th) > 1 else "arbitrary",  # H tiles: fully independent
        "parallel",                                    # sorted batch: contiguous split
        "arbitrary",                                   # t tiles
    )

    cost = pl.CostEstimate(
        flops=2 * B * T * D * H,
        transcendentals=0,
        bytes_accessed=int(B * T * D * in_itemsize * (H // th)   # x per h-tile
                           + min(B, C) * D * H * in_itemsize     # gathered W (ideal)
                           + C * H * 4                           # bias
                           + B * T * H * out_itemsize),          # out
    )

    return pl.pallas_call(
        _cat_linear_kernel,
        out_shape=jax.ShapeDtypeStruct((B, T, H), out_dtype),
        grid_spec=grid_spec,
        compiler_params=pltpu.CompilerParams(
            dimension_semantics=dim_sem,
            vmem_limit_bytes=vmem_limit,
        ),
        cost_estimate=cost,
    )(order, cat_sorted, x, W, b)


if __name__ == "__main__":
    # Small shapes consistent with the module's forward; H lane-dense (128).
    num_categories = 4
    input_dim = 64
    hidden_dim = 128
    B, T = 4, 16

    key = jax.random.PRNGKey(0)
    k_w, k_x, k_c = jax.random.split(key, 3)

    # Deterministic parameter init (matches 0.02 * randn / zeros in __init__).
    W = 0.02 * jax.random.normal(
        k_w, (num_categories, input_dim, hidden_dim), dtype=jnp.float32
    )
    b_param = jnp.zeros((num_categories, hidden_dim), dtype=jnp.float32)

    x = jax.random.normal(k_x, (B, T, input_dim), dtype=jnp.float32)
    cat_ids = jax.random.randint(k_c, (B,), 0, num_categories, dtype=jnp.int32)

    # Reference (plain JAX einsum, f32).
    ref = jnp.einsum("btd,bdh->bth", x, W[cat_ids]) + b_param[cat_ids][:, None, :]

    # 1) Exact-parity path: f32 streaming.
    out_f32 = jax.block_until_ready(
        category_specific_linear(x, cat_ids, W, b_param, compute_dtype=jnp.float32)
    )
    assert out_f32.shape == (B, T, hidden_dim)
    assert jnp.allclose(out_f32, ref, atol=1e-4, rtol=1e-4), float(
        jnp.max(jnp.abs(out_f32 - ref))
    )

    # 2) Default fast path: bf16 streaming, f32 accumulation (looser tolerance).
    out_bf16 = jax.block_until_ready(
        category_specific_linear(x, cat_ids, W, b_param)
    )
    assert out_bf16.shape == (B, T, hidden_dim)
    assert jnp.allclose(out_bf16, ref, atol=1e-2, rtol=5e-2), float(
        jnp.max(jnp.abs(out_bf16 - ref))
    )

    print("KERNEL_OK")
</pallas_src>

<mosaic_0001>
module attributes {stable_mosaic.version = 11 : i64} {
  func.func @_cat_linear_kernel(%arg0: i32, %arg1: i32, %arg2: i32, %arg3: memref<4xi32, #tpu.memory_space<smem>>, %arg4: memref<4xi32, #tpu.memory_space<smem>>, %arg5: memref<1x16x64xf32, #tpu.memory_space<vmem>>, %arg6: memref<1x64x128xf32, #tpu.memory_space<vmem>>, %arg7: memref<4x128xf32, #tpu.memory_space<vmem>>, %arg8: memref<1x16x128xf32, #tpu.memory_space<vmem>>) attributes {dimension_semantics = [#tpu.dimension_semantics<arbitrary>, #tpu.dimension_semantics<parallel>, #tpu.dimension_semantics<arbitrary>], iteration_bounds = array<i64: 1, 4, 1>, scalar_prefetch = 2 : i64, scratch_operands = 0 : i64, tpu.core_type = #tpu.core_type<tc>, window_params = [{transform_indices = @transform_0, window_bounds = array<i64: 1, 16, 64>}, {transform_indices = @transform_1, window_bounds = array<i64: 1, 64, 128>}, {transform_indices = @transform_2, window_bounds = array<i64: 4, 128>}, {transform_indices = @transform_3, window_bounds = array<i64: 1, 16, 128>}]} {
    %0 = arith.index_cast %arg1 : i32 to index
    %1 = memref.load %arg4[%0] : memref<4xi32, #tpu.memory_space<smem>>
    %c0 = arith.constant 0 : index
    %c0_0 = arith.constant 0 : index
    %c0_1 = arith.constant 0 : index
    %2 = vector.load %arg5[%c0, %c0_0, %c0_1] : memref<1x16x64xf32, #tpu.memory_space<vmem>>, vector<1x16x64xf32>
    %3 = vector.shape_cast %2 : vector<1x16x64xf32> to vector<16x64xf32>
    %c0_2 = arith.constant 0 : index
    %c0_3 = arith.constant 0 : index
    %c0_4 = arith.constant 0 : index
    %4 = vector.load %arg6[%c0_2, %c0_3, %c0_4] : memref<1x64x128xf32, #tpu.memory_space<vmem>>, vector<1x64x128xf32>
    %5 = vector.shape_cast %4 : vector<1x64x128xf32> to vector<64x128xf32>
    %cst = arith.constant dense<0.000000e+00> : vector<16x128xf32>
    %6 = tpu.matmul %3, %5, %cst {dimension_numbers = #tpu.dot_dimension_numbers<[1], [0], [0], [1], [0, 0, 1, 1], [], []>} : vector<16x64xf32>, vector<64x128xf32>, vector<16x128xf32> -> vector<16x128xf32>
    %7 = arith.index_cast %1 : i32 to index
    %c0_5 = arith.constant 0 : index
    %8 = vector.load %arg7[%7, %c0_5] : memref<4x128xf32, #tpu.memory_space<vmem>>, vector<1x128xf32>
    %9 = vector.broadcast %8 : vector<1x128xf32> to vector<16x128xf32>
    %10 = arith.addf %6, %9 : vector<16x128xf32>
    %c0_6 = arith.constant 0 : index
    %c0_7 = arith.constant 0 : index
    %c0_8 = arith.constant 0 : index
    %11 = vector.load %arg8[%c0_6, %c0_7, %c0_8] : memref<1x16x128xf32, #tpu.memory_space<vmem>>, vector<1x16x128xf32>
    %12 = vector.shape_cast %11 : vector<1x16x128xf32> to vector<16x128xf32>
    %13 = vector.shape_cast %10 : vector<16x128xf32> to vector<1x16x128xf32>
    tpu.vector_store %arg8[%c0_6, %c0_7, %c0_8], %13 {strides = array<i32>} : memref<1x16x128xf32, #tpu.memory_space<vmem>>, vector<1x16x128xf32>,
    return
  }
  func.func @transform_0(%arg0: i32, %arg1: i32, %arg2: i32, %arg3: memref<4xi32, #tpu.memory_space<smem>>, %arg4: memref<4xi32, #tpu.memory_space<smem>>) -> (i32, i32, i32) {
    %0 = arith.index_cast %arg1 : i32 to index
    %1 = memref.load %arg3[%0] : memref<4xi32, #tpu.memory_space<smem>>
    %c0_i32 = arith.constant 0 : i32
    %c0_i32_0 = arith.constant 0 : i32
    return %1, %arg2, %c0_i32 : i32, i32, i32
  }
  func.func @transform_1(%arg0: i32, %arg1: i32, %arg2: i32, %arg3: memref<4xi32, #tpu.memory_space<smem>>, %arg4: memref<4xi32, #tpu.memory_space<smem>>) -> (i32, i32, i32) {
    %0 = arith.index_cast %arg1 : i32 to index
    %1 = memref.load %arg4[%0] : memref<4xi32, #tpu.memory_space<smem>>
    %c0_i32 = arith.constant 0 : i32
    %c0_i32_0 = arith.constant 0 : i32
    return %1, %c0_i32, %arg0 : i32, i32, i32
  }
  func.func @transform_2(%arg0: i32, %arg1: i32, %arg2: i32, %arg3: memref<4xi32, #tpu.memory_space<smem>>, %arg4: memref<4xi32, #tpu.memory_space<smem>>) -> (i32, i32) {
    %c0_i32 = arith.constant 0 : i32
    %c0_i32_0 = arith.constant 0 : i32
    return %c0_i32, %arg0 : i32, i32
  }
  func.func @transform_3(%arg0: i32, %arg1: i32, %arg2: i32, %arg3: memref<4xi32, #tpu.memory_space<smem>>, %arg4: memref<4xi32, #tpu.memory_space<smem>>) -> (i32, i32, i32) {
    %0 = arith.index_cast %arg1 : i32 to index
    %1 = memref.load %arg3[%0] : memref<4xi32, #tpu.memory_space<smem>>
    %c0_i32 = arith.constant 0 : i32
    return %1, %arg2, %arg0 : i32, i32, i32
  }
}

</mosaic_0001>

<bundles_post_ra>
// kernel: tpu_custom_call.1
= control target key start
LH: loop header
LB: loop body
LE: loop exit
PB: predicated region body
PF: predicated region fallthrough
CT: control target
= control target key end

     0   :  { %s948_s18 = smov [#allocation3]   ;;  %s1324_s0 = inlined_call_operand.hbm [shape: s32[4], index: 0, kind: input, shape index: {}]   ;;  %s1325_s2 = inlined_call_operand.hbm [shape: f32[4,16,64], index: 2, kind: input, shape index: {}]   ;;  %s1326_s3 = inlined_call_operand.hbm [shape: f32[4,64,128], index: 3, kind: input, shape index: {}]   ;;  %s1327_s4 = inlined_call_operand.vmem [shape: f32[4,128], index: 4, kind: input, shape index: {}]   ;;  %s1328_s5 = inlined_call_operand.hbm [shape: f32[4,16,128], index: 5, kind: output, shape index: {}]   ;;  %s1329_s1 = inlined_call_operand.vmem [shape: s32[4], index: 1, kind: input, shape index: {}]  }
   0x1   :  { %1342 = sst [smem:[#allocation26_spill]] %s1328_s5  ;;  %s12_s23 = sshll.u32 %s1329_s1, 4  ;;  %s13_s23 = int_to_ptr.vmem [resolvable:$true] %s12_s23 }
   0x2   :  { %11 = dma.hbm_to_smem %s1324_s0, 16, %s948_s18, [#allocation2] }
   0x3   :  { %s744_s24 = scalar_lea.vmem %s13_s23, 16  ;;  %p749_p1 = scmp.lt.s32.totalorder %s13_s23, %s13_s23 }
   0x4   :  { %p745_p0 = scmp.ne.s32.totalorder %s13_s23, %s744_s24  ;;  %p750_p2 = scmp.lt.s32.totalorder %s744_s24, %s744_s24 }
   0x6   :  { %p751_p3 = por %p750_p2, %p749_p1 }
   0x8   :  { %p752_p4 = pnand %p751_p3, %p745_p0 }
   0xa   :  { %755 = shalt.err (!%p752_p4)  }
   0xb   :  { %s949_s25 = smov [#allocation4]  }
   0xc   :  { %15 = dma.vmem_to_smem %s13_s23, 16, %s949_s25, [#allocation2] }
   0xd   :  { %886 = dma.done.wait [#allocation2], 32 }
   0xe   :  { %887 = vsyncadd [#allocation2], 4294967264 }
   0xf   :  { %17 = sfence }
  0x10   :  { %18 = vsyncpa [#allocation6], 0 }
  0x11   :  { %20 = vsyncpa [#allocation6 + $0x1], 0 }
  0x12   :  { %21 = vsyncpa [#allocation9], 0 }
  0x13   :  { %23 = vsyncpa [#allocation9 + $0x1], 0 }
  0x14   :  { %24 = vsyncpa [#allocation7], 0 }
  0x15   :  { %26 = vsyncpa [#allocation7 + $0x1], 0  ;;  %s993_s0 = smov 0   ;;  %s995_s1 = smov 0  }
  0x16   :  { %s997_s26 = smov 0   ;;  %s999_s27 = smov 0  }
  0x17   :  { %s1001_s28 = smov 0   ;;  %s1003_s29 = smov 0  }
  0x18   :  { %s1005_s30 = smov 0   ;;  %s1007_s6 = smov 0  }
  0x19   :  { %s1009_s7 = smov 0   ;;  %s1011_s8 = smov 0  }
  0x1a   :  { %s1013_s9 = smov 0   ;;  %s1015_s10 = smov 0  }
  0x1b LB: > { %1343 = sst [smem:[#allocation20_spill]] %s902_s0  ;;  %s550_s11 = sadd.s32 4294967295, %s946_s10   ;;  %s946_s10 = sphi %s1015_s10, %s32_s10   ;;  %s942_s9 = sphi %s1013_s9, %s1384_s9   ;;  %s938_s8 = sphi %s1011_s8, %s1383_s8   ;;  %s934_s7 = sphi %s1009_s7, %s1374_s7   ;;  %s930_s6 = sphi %s1007_s6, %s1382_s6   ;;  %s926_s30 = sphi %s1005_s30, %s1381_s30   ;;  %s922_s29 = sphi %s1003_s29, %s1380_s29   ;;  %s918_s28 = sphi %s1001_s28, %s1379_s28   ;;  %s914_s27 = sphi %s999_s27, %s1378_s27   ;;  %s910_s26 = sphi %s997_s26, %s1372_s26   ;;  %s906_s1 = sphi %s995_s1, %s1377_s1   ;;  %s902_s0 = sphi %s993_s0, %s1376_s0  }
  0x1c   : > { %1344 = sst [smem:[#allocation21_spill]] %s910_s26  ;;  %s551_s12 = sadd.s32 4294967294, %s946_s10  }
  0x1d   : > { %1345 = sst [smem:[#allocation22_spill]] %s934_s7  ;;  %s47_s13 = sadd.s32 1, %s942_s9 }
  0x1e   : > { %s55_s14 = sld [smem:[#allocation3 + %s942_s9]]  ;;  %p49_p5 = scmp.ge.s32.totalorder %s47_s13, 4 }
  0x1f   : > { %s62_s15 = sadd.s32 1, %s934_s7  ;;  %p69_p6 = scmp.ne.s32.totalorder %s934_s7, %s930_s6 }
  0x20   : > { %p1335_p7 = scmp.eq.s32.totalorder %s946_s10, 0  ;;  %s1386_s13 = smov (%p49_p5, %s47_s13), 0 }
  0x21   : > { %1346 = sst [smem:[#allocation23_spill]] %s1386_s13  ;;  %p75_p9 = scmp.ne.s32.totalorder %s930_s6, %s926_s30 }
  0x22   : > { %p1063_p8 = por %p1335_p7, %p69_p6  ;;  %s56_s17 = sld [smem:[#allocation3 + %s1386_s13]] }
  0x23   : > { %p1069_p10 = scmp.eq.s32.totalorder %s550_s11, 0  ;;  %s141_s19 = sld [smem:[#allocation3 + %s942_s9]] }
  0x24   : > { %s150_s20 = sadd.s32 1, %s910_s26  ;;  %s142_s22 = sld [smem:[#allocation3 + %s1386_s13]] }
  0x25   : > { %s1348_s18 = scalar_select %p1069_p10, 1, 0 }
  0x26   : > { %p1077_p11 = por %p1069_p10, %p75_p9  ;;  %p160_p12 = scmp.ne.s32.totalorder %s910_s26, %s906_s1 }
  0x27   : > { %p161_p13 = scmp.eq.s32.totalorder %s550_s11, 3  ;;  %p166_p0 = scmp.ne.s32.totalorder %s906_s1, %s902_s0 }
  0x28   : > { %s1349_s21 = scalar_select %p1077_p11, 1, 0 }
  0x29   : > { %p167_p1 = scmp.eq.s32.totalorder %s551_s12, 3  ;;  %p1086_p2 = por %p161_p13, %p160_p12 }
  0x2a   : > { %s57_s24 = ssub.s32 %s55_s14, %s56_s17  ;;  %p1334_p5 = scmp.lt.s32.totalorder %s946_s10, 4 }
  0x2b   : > { %s1350_s23 = scalar_select %p1086_p2, 1, 0 }
  0x2c   : > { %p1090_p3 = por %p167_p1, %p166_p0  ;;  %p60_p4 = scmp.eq.s32.totalorder %s57_s24, 0 }
  0x2d   : > { %s143_s30 = ssub.s32 %s141_s19, %s142_s22  ;;  %s194_s11 = sand.u32 1, %s934_s7  }
  0x2e   : > { %s1351_s25 = scalar_select %p1090_p3, 1, 0 }
  0x2f   : > { %s1097_s5 = scalar_select %p60_p4, %s934_s7, %s62_s15  }
  0x30   : > { %p148_p6 = scmp.eq.s32.totalorder %s143_s30, 0  ;;  %s555_s12 = sshll.u32 %s194_s11, 4 }
  0x31   : > { %1352 = sst [smem:[#allocation24_spill]] %s1097_s5  ;;  %p1103_p9 = pnand %p1334_p5, %p1063_p8 }
  0x32   : > { %s1108_s14 = scalar_select %p148_p6, %s910_s26, %s150_s20  }
  0x33   : > { %s605_s17 = scalar_select %p1063_p8, [#allocation3], [#allocation11] }
  0x34   : > { %1354 = sst [smem:[#allocation25_spill]] %s1108_s14  ;;  %s198_s15 = scalar_lea.vmem [#allocation5], %s555_s12 }
  0x35   : > { %s606_s19 = scalar_select %p1063_p8, %s942_s9, 0 }
  0x36   : > { %s1388_s17 = smov (!%p1334_p5, %s605_s17), [#allocation14]  ;;  %s208_s22 = sshll.u32 %s198_s15, 4  ;;  %s1119_s22 = int_to_ptr.vmem [resolvable:$true] %s208_s22 }
  0x37   : > { %s1390_s19 = smov (!%p1334_p5, %s606_s19), 0  ;;  %p561_p12 = scmp.ge.s32.totalorder %s946_s10, 1 }
  0x38   : > { %s199_s24 = sld [smem:[%s1388_s17 + %s1390_s19]]  ;;  %p239_p13 = scmp.lt.s32.totalorder %s946_s10, 5 }
  0x39   : > { %s1128_s5 = sld [smem:[#allocation4 + %s942_s9]]  ;;  %s1138_s17 = scalar_lea.sflag [#allocation6], %s194_s11 }
  0x3a   : > { %p1123_p0 = pnand %p561_p12, %p239_p13  ;;  %s1136_s12 = sld [smem:[#allocation4 + %s1386_s13]] }
  0x3b   : > { %p758_p1 = pneg %p1103_p9  ;;  %s761_s26 = scalar_lea.hbm %s1325_s2, 1024 }
  0x3c   : > { %s1355_s30 = scalar_select %p1123_p0, 1, 0 }
  0x3e   : > { %s573_s20 = sshll.u32 %s199_s24, 8 }
  0x3f   : > { %s1133_s14 = scalar_lea.hbm %s1325_s2, %s573_s20 }
  0x40   : > { %s756_s19 = scalar_lea.hbm %s1133_s14, 256  ;;  %p762_p12 = scmp.lt.s32.totalorder %s1133_s14, %s1325_s2 }
  0x41   : > { %p757_p8 = scmp.ne.s32.totalorder %s1133_s14, %s756_s19  ;;  %p763_p13 = scmp.lt.s32.totalorder %s761_s26, %s756_s19 }
  0x43   : > { %p759_p4 = pnand %p758_p1, %p757_p8  ;;  %p764_p5 = por %p763_p13, %p762_p12 }
  0x45   : > { %p760_p6 = pneg %p759_p4 }
  0x47   : > { %p765_p7 = pnand %p764_p5, %p760_p6 }
  0x49   : > { %768 = shalt.err (!%p765_p7)
}
  0x4a   : > { %s769_s11 = scalar_lea.vmem %s1119_s22, 256  ;;  %s950_s16 = smov [#allocation5]  }
  0x4b   : > { %p770_p3 = scmp.ne.s32.totalorder %s1119_s22, %s769_s11  ;;  %s774_s13 = sshll.u32 %s950_s16, 4  ;;  %s775_s13 = int_to_ptr.vmem [resolvable:$false] %s774_s13 }
  0x4c   : > { %s776_s15 = scalar_lea.vmem %s775_s13, 512  ;;  %p777_p4 = scmp.lt.s32.totalorder %s1119_s22, %s775_s13 }
  0x4d   : > { %p772_p2 = pnand %p770_p3, %p758_p1  ;;  %p778_p11 = scmp.lt.s32.totalorder %s776_s15, %s769_s11 }
  0x4f   : > { %p773_p8 = pneg %p772_p2  ;;  %p779_p0 = por %p778_p11, %p777_p4 }
  0x51   : > { %p780_p10 = pnand %p779_p0, %p773_p8 }
  0x53   : > { %783 = shalt.err (!%p780_p10)
}
  0x54   : > { %s1340_s26 = smov 128   ;;  %s952_s13 = smov 8  }
  0x55   : > { %622 = dma.hbm_to_vmem [thread:$0]  (!%p1103_p9), %s1133_s14, 256, %s1119_s22, %s1138_s17, %s1340_s26, %s1340_s26, %s952_s13  }
  0x56   : > { %p99_p7 = scmp.ne.s32.totalorder %s922_s29, %s918_s28  ;;  %p105_p10 = scmp.ne.s32.totalorder %s918_s28, %s914_s27 }
  0x57   : > { %p1356_p11 = scmp.eq.s32.totalorder %s946_s10, 0  ;;  %s218_s19 = sand.u32 1, %s922_s29  }
  0x58   : > { %p1357_p3 = scmp.ne.s32.totalorder %s1348_s18, 0  ;;  %s87_s7 = ssub.s32 %s1128_s5, %s1136_s12 }
  0x59   : > { %p101_p2 = por %p99_p7, %p1356_p11  ;;  %s92_s20 = sadd.s32 1, %s922_s29 }
  0x5a   : > { %p1171_p5 = por %p105_p10, %p1357_p3  ;;  %p90_p0 = scmp.eq.s32.totalorder %s87_s7, 0 }
  0x5b   : > { %s558_s11 = sshll.u32 %s218_s19, 6  ;;  %p1359_p1 = scmp.lt.s32.totalorder %s946_s10, 4 }
  0x5c   : > { %s1358_s24 = scalar_select %p1171_p5, 1, 0 }
  0x5d   : > { %s608_s0 = scalar_select %p101_p2, [#allocation4], [#allocation12] }
  0x5e   : > { %s1179_s16 = scalar_select %p90_p0, %s922_s29, %s92_s20  }
  0x5f   : > { %s609_s15 = scalar_select %p101_p2, %s942_s9, 0 }
  0x60   : > { %s1392_s0 = smov (!%p1359_p1, %s608_s0), [#allocation15]  ;;  %p1360_p9 = pmov %p1359_p1 }
  0x61   : > { %p1361_p6 = pmov %p1359_p1  ;;  %s222_s14 = scalar_lea.vmem [#allocation8], %s558_s11 }
  0x62   : > { %s1394_s15 = smov (!%p1360_p9, %s609_s15), 0  ;;  %s231_s5 = sshll.u32 %s222_s14, 4  ;;  %s1192_s5 = int_to_ptr.vmem [resolvable:$true] %s231_s5 }
  0x63   : > { %p1188_p12 = pnand %p1361_p6, %p101_p2  ;;  %s223_s18 = sld [smem:[%s1392_s0 + %s1394_s15]] }
  0x64   : > { %s1199_s20 = scalar_lea.sflag [#allocation9], %s218_s19  ;;  %s789_s15 = scalar_lea.hbm %s1326_s3, 4096 }
  0x65   : > { %p786_p8 = pneg %p1188_p12 }
  0x69   : > { %s574_s22 = sshll.u32 %s223_s18, 10 }
  0x6a   : > { %s1197_s7 = scalar_lea.hbm %s1326_s3, %s574_s22 }
  0x6b   : > { %s784_s26 = scalar_lea.hbm %s1197_s7, 1024  ;;  %p790_p10 = scmp.lt.s32.totalorder %s1197_s7, %s1326_s3 }
  0x6c   : > { %p785_p13 = scmp.ne.s32.totalorder %s1197_s7, %s784_s26  ;;  %p791_p11 = scmp.lt.s32.totalorder %s789_s15, %s784_s26 }
  0x6e   : > { %p787_p4 = pnand %p786_p8, %p785_p13  ;;  %p792_p2 = por %p791_p11, %p790_p10 }
  0x70   : > { %p788_p7 = pneg %p787_p4 }
  0x72   : > { %p793_p3 = pnand %p792_p2, %p788_p7 }
  0x74   : > { %796 = shalt.err (!%p793_p3)
}
  0x75   : > { %s797_s19 = scalar_lea.vmem %s1192_s5, 1024  ;;  %s953_s22 = smov [#allocation8]  }
  0x76   : > { %p798_p0 = scmp.ne.s32.totalorder %s1192_s5, %s797_s19  ;;  %s802_s12 = sshll.u32 %s953_s22, 4  ;;  %s803_s12 = int_to_ptr.vmem [resolvable:$false] %s802_s12 }
  0x77   : > { %s804_s17 = scalar_lea.vmem %s803_s12, 2048  ;;  %p805_p6 = scmp.lt.s32.totalorder %s1192_s5, %s803_s12 }
  0x78   : > { %p800_p1 = pnand %p798_p0, %p786_p8  ;;  %p806_p13 = scmp.lt.s32.totalorder %s804_s17, %s797_s19 }
  0x7a   : > { %p801_p9 = pneg %p800_p1  ;;  %p807_p4 = por %p806_p13, %p805_p6 }
  0x7c   : > { %p808_p5 = pnand %p807_p4, %p801_p9 }
  0x7e   : > { %811 = shalt.err (!%p808_p5)
}
  0x7f   : > { %s1363_s26 = smov 128   ;;  %p1364_p8 = scmp.ne.s32.totalorder %s1355_s30, 0 }
  0x80   : > { %627 = dma.hbm_to_vmem [thread:$0]  (!%p1188_p12), %s1197_s7, 1024, %s1192_s5, %s1199_s20, %s1363_s26, %s1363_s26, %s952_s13  }
  0x81   : > { %243 = sbr.rel (%p1364_p8) target bundleno = 367 (0x16f), region = 32  ;;  %s245_s11 = sand.u32 (!%p1364_p8), 1, %s930_s6  }
  0x82   : > { %s1226_s0 = sshll.u32 (!%p1364_p8), %s245_s11, 4  ;;  %s246_s15 = scalar_lea.sflag (!%p1364_p8), [#allocation6], %s245_s11 }
  0x83   : > { %s249_s18 = scalar_lea.vmem (!%p1364_p8), [#allocation5], %s1226_s0  ;;  %p1365_p5 = scmp.ne.s32.totalorder (!%p1364_p8), %s1349_s21, 0 }
  0x86   : > { %889 = dma.done.wait (%p1365_p5), %s246_s15, 256  }
  0x87   : > { %891 = vsyncadd (%p1365_p5), %s246_s15, 4294967040  ;;  %s254_s27 = sand.u32 1, %s918_s28   ;;  %p1366_p12 = scmp.ne.s32.totalorder %s1358_s24, 0 }
  0x88   : > { %s563_s13 = sshll.u32 %s254_s27, 6  ;;  %s255_s5 = scalar_lea.sflag [#allocation9], %s254_s27 }
  0x89   : > { %s258_s30 = scalar_lea.vmem [#allocation8], %s563_s13 }
  0x8a   : > { %893 = dma.done.wait (%p1366_p12), %s255_s5, 1024  }
  0x8b   : > { %895 = vsyncadd (%p1366_p12), %s255_s5, 4294966272  ;;  %v309_v0 = vld [vmem:[%s258_s30 + $0x38] sm:$0xff]  ;;  %v308_v1 = vld [vmem:[%s258_s30 + $0x30] sm:$0xff]  ;;  %vm316_vm0 = vcmask 523264   ;;  %s299_s21 = sld [smem:[#allocation4 + %s938_s8]]  ;;  %p1367_p7 = scmp.ne.s32.totalorder %s1350_s23, 0 }
  0x8c   : > { %586 = vmatprep.subr.mxu0 %v309_v0  ;;  %v307_v2 = vld [vmem:[%s258_s30 + $0x28] sm:$0xff]  ;;  %v300_v3 = vld [vmem:[%s249_s18] sm:$0xff]  ;;  %v305_v5 = vld [vmem:[%s258_s30 + $0x18] sm:$0xff]  ;;  %s287_s7 = sand.u32 1, %s906_s1   ;;  %s1368_s15 = sld [smem:[#allocation26_spill]] }
  0x8d   : > { %587 = vmatpush3.msra.mxu0 %v309_v0  ;;  %602 = vmatprep.mubr.msk.f32.mxu0 %vm316_vm0, %v300_v3  ;;  %v306_v4 = vld [vmem:[%s258_s30 + $0x20] sm:$0xff]  ;;  %v304_v6 = vld [vmem:[%s258_s30 + $0x10] sm:$0xff]  ;;  %v303_v7 = vld [vmem:[%s258_s30 + $0x8] sm:$0xff]  ;;  %s613_s24 = scalar_select %p1367_p7, [#allocation3], [#allocation13] }
  0x8e   : > { %588 = vmatprep.subr.mxu0 %v308_v1  ;;  %v302_v8 = vld [vmem:[%s258_s30] sm:$0xff]  ;;  %v301_v9 = vld [vmem:[%s249_s18 + $0x8] sm:$0xff]  ;;  %s1396_s8 = smov (!%p1367_p7, %s938_s8), 0  ;;  %s564_s14 = sshll.u32 %s287_s7, 4 }
  0x8f   : > { %589 = vmatpush3.msra.mxu0 %v308_v1  ;;  %s408_s20 = sld [smem:[%s613_s24 + %s1396_s8]]  ;;  %s289_s17 = scalar_lea.vmem [#allocation10], %s564_s14 }
  0x90   : > { %590 = vmatprep.subr.mxu0 %v307_v2  ;;  %s418_s26 = sshll.u32 %s289_s17, 4  ;;  %s1261_s27 = scalar_lea.sflag [#allocation7], %s287_s7  ;;  %s1254_s26 = int_to_ptr.vmem [resolvable:$true] %s418_s26 }
  0x91   : > { %591 = vmatpush3.msra.mxu0 %v307_v2  ;;  %s310_s12 = scalar_lea.vmem %s1327_s4, %s299_s21  ;;  %s812_s13 = scalar_lea.vmem %s1254_s26, 256 }
  0x92   : > { %592 = vmatprep.subr.mxu0 %v306_v4  ;;  %v565_v10 = vld [vmem:[%s310_s12] ss:$0 sm:$0xff]  ;;  %p813_p10 = scmp.ne.s32.totalorder %s1254_s26, %s812_s13  ;;  %s954_s5 = smov [#allocation10]  }
  0x93   : > { %593 = vmatpush3.msra.mxu0 %v306_v4  ;;  %s816_s30 = sshll.u32 %s954_s5, 4  ;;  %s817_s30 = int_to_ptr.vmem [resolvable:$false] %s816_s30 }
  0x94   : > { %594 = vmatprep.subr.mxu0 %v305_v5  ;;  %p814_p11 = pnand %p813_p10, %p1367_p7  ;;  %s818_s21 = scalar_lea.vmem %s817_s30, 512 }
  0x95   : > { %595 = vmatpush3.msra.mxu0 %v305_v5  ;;  %s575_s11 = sshll.u32 %s408_s20, 8  ;;  %p819_p3 = scmp.lt.s32.totalorder %s1254_s26, %s817_s30 }
  0x96   : > { %596 = vmatprep.subr.mxu0 %v304_v6  ;;  %s1259_s18 = scalar_lea.hbm %s1368_s15, %s575_s11  ;;  %p815_p2 = pneg %p814_p11 }
  0x97   : > { %597 = vmatpush3.msra.mxu0 %v304_v6  ;;  %p820_p0 = scmp.lt.s32.totalorder %s818_s21, %s812_s13 }
  0x98   : > { %598 = vmatprep.subr.mxu0 %v303_v7 }
  0x99   : > { %599 = vmatpush3.msra.mxu0 %v303_v7  ;;  %p821_p1 = por %p820_p0, %p819_p3 }
  0x9a   : > { %600 = vmatprep.subr.mxu0 %v302_v8 }
  0x9b   : > { %601 = vmatpush3.msra.mxu0 %v302_v8  ;;  %p822_p9 = pnand %p821_p1, %p815_p2 }
  0x9c   : > { %603 = vmatmul.mubr.msk.f32.vlgmr.msra.gmra.mxu0 %vm316_vm0, %v301_v9 }
 0x15c   : > { %v604_v11 = vpop.f32.mrf.mxu0 }
 0x15d   : > { %v395_v12 = vadd.f32 %v604_v11, %v565_v10 }
 0x15e   : > { %v389_v13 = vpop.f32.mrf.mxu0 }
 0x15f   : > { %399 = vst [vmem:[%s289_s17 + $0x8] sm:$0xff] %v395_v12  ;;  %v390_v14 = vadd.f32 %v565_v10, %v389_v13 }
 0x161   : > { %398 = vst [vmem:[%s289_s17] sm:$0xff] %v390_v14 }
 0x162   : > { %825 = shalt.err (!%p822_p9)
}
 0x163   : > { %s826_s24 = scalar_lea.hbm %s1259_s18, 256  ;;  %s830_s14 = scalar_lea.hbm %s1368_s15, 1024 }
 0x164   : > { %p827_p6 = scmp.ne.s32.totalorder %s1259_s18, %s826_s24  ;;  %p831_p8 = scmp.lt.s32.totalorder %s1259_s18, %s1368_s15 }
 0x165   : > { %p832_p5 = scmp.lt.s32.totalorder %s830_s14, %s826_s24 }
 0x166   : > { %p828_p13 = pnand %p827_p6, %p1367_p7 }
 0x167   : > { %p833_p12 = por %p832_p5, %p831_p8 }
 0x168   : > { %p829_p4 = pneg %p828_p13 }
 0x16a   : > { %p834_p10 = pnand %p833_p12, %p829_p4 }
 0x16c   : > { %837 = shalt.err (!%p834_p10)
}
 0x16d   : > { %s955_s12 = smov 128   ;;  %s956_s17 = smov 8  }
 0x16e   : > { %615 = dma.vmem_to_hbm [thread:$0]  (%p1367_p7), %s1254_s26, 256, %s1259_s18, %s1261_s27, %s955_s12, %s955_s12, %s956_s17  }
 0x16f PF: > { %s1369_s11 = sld [smem:[#allocation20_spill]]  ;;  %p633_p11 = scmp.ge.s32.totalorder %s946_s10, 2 }
 0x170   : > { %p1370_p2 = scmp.ne.s32.totalorder %s1351_s25, 0 }
 0x172   : > { %p629_p3 = pnand %p633_p11, %p1370_p2 }
 0x174   : > { %p630_p0 = pneg %p629_p3 }
 0x175   : > { %s433_s8 = sand.u32 1, %s1369_s11  }
 0x176   : > { %s434_s0 = scalar_lea.sflag [#allocation7], %s433_s8 }
 0x177   : > { %897 = dma.done.wait (%p630_p0), %s434_s0, 256  }
 0x178   : > { %899 = vsyncadd (%p630_p0), %s434_s0, 4294967040  ;;  %s32_s10 = sadd.s32 1, %s946_s10   ;;  %s1371_s13 = sld [smem:[#allocation21_spill]] }
 0x179   : > { %p29_p1 = scmp.ge.s32.totalorder %s32_s10, 6   ;;  %s1372_s26 = sld [smem:[#allocation25_spill]] }
 0x17a   : > { %s1373_s23 = sld [smem:[#allocation22_spill]]  ;;  %s1376_s0 = smov %s906_s1 }
 0x17b   : > { %s1374_s7 = sld [smem:[#allocation24_spill]]  ;;  %s1378_s27 = smov %s918_s28 }
 0x17c   : > { %s1375_s18 = sld [smem:[#allocation23_spill]]  ;;  %s1379_s28 = smov %s922_s29 }
 0x17d   : > { %s1380_s29 = smov %s1179_s16  ;;  %s1381_s30 = smov %s930_s6 }
 0x17e   : > { %s1377_s1 = smov %s1371_s13  ;;  %s1383_s8 = smov %s942_s9 }
 0x17f   :  { %31 = sbr.rel (!%p29_p1) target bundleno = 27 (0x1b), region = 94 }
 0x180   : > { %s1382_s6 = smov %s1373_s23 }
 0x182   : > { %s1384_s9 = smov %s1375_s18 }
 0x184   :  { %439 = vsyncpa [#allocation6], 1 }
 0x185   :  { %441 = vsyncpa [#allocation6 + $0x1], 1 }
 0x186   :  { %442 = vsyncpa [#allocation9], 1 }
 0x187   :  { %444 = vsyncpa [#allocation9 + $0x1], 1 }
 0x188   :  { %445 = vsyncpa [#allocation7], 1 }
 0x189   :  { %447 = vsyncpa [#allocation7 + $0x1], 1 }

</bundles_post_ra>
